<compile_context>
chip_gen: v6e
topology: v6e:2x2x1
jax: 0.10.0
libtpu: 0.0.40
codegen_flags: <defaults>
</compile_context>

<pallas_src>
import functools

import jax
import jax.numpy as jnp
from jax import lax
from jax.experimental import pallas as pl
from jax.experimental.pallas import tpu as pltpu

EPS = 1e-5


# ----------------------------------------------------------------------------
# Hardware-aware sizing helpers (trace-time Python only).
# ----------------------------------------------------------------------------
def _round_up(x, m):
    return ((x + m - 1) // m) * m


@functools.lru_cache(maxsize=None)
def _vmem_capacity_bytes():
    try:
        return int(pltpu.get_tpu_info().vmem_capacity_bytes)
    except Exception:
        return 64 * 1024 * 1024  # conservative (v7x-sized) fallback


def _vmem_limit(footprint_bytes, cap):
    """Scoped-VMEM request: actual buffer footprint with 2x headroom for the
    compiler's intermediates, never the whole physical VMEM."""
    return int(min(cap * 3 // 4, max(2 * footprint_bytes, 16 * 1024 * 1024)))


def _channel_step(bpe):
    # Sublane packing: (8,128) f32, (16,128) bf16, (32,128) 8-bit.
    return max(8, 32 // bpe)


def _fused_c_tile(N, C, hw_c, hw_s, bpe, budget):
    """Channel tile for the single fused kernel, or None if nothing fits.

    Real double-buffered footprint per grid step:
        2 (pipeline bufs) * c_tile * (hw_c in + hw_c out + hw_s in) * bpe.
    """
    def footprint(ct):
        return 2 * ct * (2 * hw_c + hw_s) * bpe

    step = _channel_step(bpe)
    if C % step != 0:
        return C if footprint(C) <= budget else None

    cands = [ct for ct in range(step, C + 1, step)
             if C % ct == 0 and footprint(ct) <= budget]
    if not cands:
        return None
    if N == 1:
        # v7x has 2 TensorCores: keep >= 2 parallel grid cells when possible.
        split = [ct for ct in cands if C // ct >= 2]
        if split:
            cands = split
    return max(cands)


def _pick_hw_chunk(c_tile, hw, bpe, budget, max_hw_chunk=None):
    """Largest multiple-of-128 spatial chunk assuming <=2 hw-sized streams/step."""
    max_chunk = budget // (2 * 2 * c_tile * bpe)
    max_chunk = max(128, (max_chunk // 128) * 128)
    chunk = min(max_chunk, _round_up(hw, 128))
    if max_hw_chunk is not None:
        chunk = min(chunk, max(128, (max_hw_chunk // 128) * 128))
    return chunk


# ----------------------------------------------------------------------------
# Fast path: one fused kernel (stats + normalize + re-style).
# ----------------------------------------------------------------------------
def _adain_fused_kernel(c_ref, s_ref, o_ref):
    """c_ref: [Ct, HWc]  s_ref: [Ct, HWs]  o_ref: [Ct, HWc]  (batch squeezed)."""
    c = c_ref[...]
    s = s_ref[...]
    hw_c = c.shape[-1]
    hw_s = s.shape[-1]

    # Single-pass per-channel moments over the lane axis, f32 accumulation.
    c_sum = jnp.sum(c, axis=-1, keepdims=True, dtype=jnp.float32)
    c_sq = jnp.sum(jnp.square(c.astype(jnp.float32)), axis=-1, keepdims=True)
    s_sum = jnp.sum(s, axis=-1, keepdims=True, dtype=jnp.float32)
    s_sq = jnp.sum(jnp.square(s.astype(jnp.float32)), axis=-1, keepdims=True)

    c_mean = c_sum / hw_c
    s_mean = s_sum / hw_s
    # Unbiased variance, matching torch.var(dim=2). (hw==1 -> inf, same as torch.)
    c_var = (c_sq - hw_c * c_mean * c_mean) / (hw_c - 1)
    s_var = (s_sq - hw_s * s_mean * s_mean) / (hw_s - 1)

    # Fold normalize + re-style into one per-channel scale/shift (rsqrt -> EUP).
    scale = jnp.sqrt(s_var + EPS) * lax.rsqrt(c_var + EPS)
    shift = s_mean - c_mean * scale

    # Epilogue in the content's native dtype; exact f32 math for f32 inputs.
    o_ref[...] = (c * scale.astype(c.dtype) + shift.astype(c.dtype)).astype(o_ref.dtype)


def _adain_fused(c3, s3, c_tile, cap):
    N, C, hw_c = c3.shape
    hw_s = s3.shape[-1]
    bpe = max(c3.dtype.itemsize, s3.dtype.itemsize)
    footprint = 2 * c_tile * (2 * hw_c + hw_s) * bpe
    grid = (N, C // c_tile)
    return pl.pallas_call(
        _adain_fused_kernel,
        out_shape=jax.ShapeDtypeStruct((N, C, hw_c), c3.dtype),
        grid_spec=pltpu.PrefetchScalarGridSpec(
            num_scalar_prefetch=0,
            grid=grid,
            in_specs=[
                pl.BlockSpec((pl.Squeezed(), c_tile, hw_c), lambda n, ci: (n, ci, 0)),
                pl.BlockSpec((pl.Squeezed(), c_tile, hw_s), lambda n, ci: (n, ci, 0)),
            ],
            out_specs=pl.BlockSpec((pl.Squeezed(), c_tile, hw_c),
                                   lambda n, ci: (n, ci, 0)),
        ),
        compiler_params=pltpu.CompilerParams(
            dimension_semantics=("parallel", "parallel"),
            vmem_limit_bytes=_vmem_limit(footprint, cap),
        ),
    )(c3, s3)


# ----------------------------------------------------------------------------
# Fallback path: streaming moments + lane-chunked apply (large H*W / odd C).
# ----------------------------------------------------------------------------
def _moments_kernel(x_ref, mean_ref, var_ref, sum_sc, sq_sc, *, hw_total, hw_chunk):
    """Accumulate per-channel sum / sumsq over spatial chunks (grid axis 2)."""
    k = pl.program_id(2)

    @pl.when(k == 0)
    def _():
        sum_sc[...] = jnp.zeros_like(sum_sc)
        sq_sc[...] = jnp.zeros_like(sq_sc)

    x = x_ref[...]                                            # [Ct, hw_chunk]
    lane = lax.broadcasted_iota(jnp.int32, x.shape, x.ndim - 1)
    valid = (k * hw_chunk + lane) < hw_total                  # mask padded tail
    xf = jnp.where(valid, x.astype(jnp.float32), 0.0)
    sum_sc[...] += jnp.sum(xf, axis=-1, keepdims=True)
    sq_sc[...] += jnp.sum(xf * xf, axis=-1, keepdims=True)

    @pl.when(k == pl.num_programs(2) - 1)
    def _():
        n = jnp.float32(hw_total)
        mean = sum_sc[...] / n
        mean_ref[...] = mean
        var_ref[...] = (sq_sc[...] - n * mean * mean) / (n - 1.0)


def _moments(x3, c_tile, hw_chunk, cap):
    """Per-(n, c) mean and unbiased var of x3: [N, C, HW] -> two [N, C, 1] f32."""
    N, C, hw = x3.shape
    bpe = x3.dtype.itemsize
    footprint = 2 * c_tile * hw_chunk * bpe
    grid = (N, pl.cdiv(C, c_tile), pl.cdiv(hw, hw_chunk))
    kern = functools.partial(_moments_kernel, hw_total=hw, hw_chunk=hw_chunk)
    return pl.pallas_call(
        kern,
        out_shape=(jax.ShapeDtypeStruct((N, C, 1), jnp.float32),
                   jax.ShapeDtypeStruct((N, C, 1), jnp.float32)),
        grid_spec=pltpu.PrefetchScalarGridSpec(
            num_scalar_prefetch=0,
            grid=grid,
            in_specs=[
                pl.BlockSpec((pl.Squeezed(), c_tile, hw_chunk),
                             lambda n, ci, k: (n, ci, k)),
            ],
            out_specs=(
                pl.BlockSpec((pl.Squeezed(), c_tile, 1), lambda n, ci, k: (n, ci, 0)),
                pl.BlockSpec((pl.Squeezed(), c_tile, 1), lambda n, ci, k: (n, ci, 0)),
            ),
            scratch_shapes=[pltpu.VMEM((c_tile, 1), jnp.float32),
                            pltpu.VMEM((c_tile, 1), jnp.float32)],
        ),
        compiler_params=pltpu.CompilerParams(
            dimension_semantics=("parallel", "parallel", "arbitrary"),
            vmem_limit_bytes=_vmem_limit(footprint, cap),
        ),
    )(x3)


def _apply_kernel(c_ref, scale_ref, shift_ref, o_ref):
    """out = content * scale + shift with per-channel scale/shift."""
    c = c_ref[...]                     # [Ct, hw_chunk]
    scale = scale_ref[...]             # [Ct, 1] f32
    shift = shift_ref[...]
    o_ref[...] = (c * scale.astype(c.dtype) + shift.astype(c.dtype)).astype(o_ref.dtype)


def _adain_two_phase(c3, s3, c_tile, hw_chunk_c, hw_chunk_s, cap):
    N, C, hw_c = c3.shape
    bpe = c3.dtype.itemsize

    c_mean, c_var = _moments(c3, c_tile, hw_chunk_c, cap)
    s_mean, s_var = _moments(s3, c_tile, hw_chunk_s, cap)

    # Tiny [N, C, 1] epilogue math — plain XLA ops, negligible traffic.
    scale = jnp.sqrt(s_var + EPS) * lax.rsqrt(c_var + EPS)
    shift = s_mean - c_mean * scale

    footprint = 2 * 2 * c_tile * hw_chunk_c * bpe      # content in + out, x2 bufs
    grid = (N, pl.cdiv(C, c_tile), pl.cdiv(hw_c, hw_chunk_c))
    return pl.pallas_call(
        _apply_kernel,
        out_shape=jax.ShapeDtypeStruct((N, C, hw_c), c3.dtype),
        grid_spec=pltpu.PrefetchScalarGridSpec(
            num_scalar_prefetch=0,
            grid=grid,
            in_specs=[
                pl.BlockSpec((pl.Squeezed(), c_tile, hw_chunk_c),
                             lambda n, ci, k: (n, ci, k)),
                pl.BlockSpec((pl.Squeezed(), c_tile, 1), lambda n, ci, k: (n, ci, 0)),
                pl.BlockSpec((pl.Squeezed(), c_tile, 1), lambda n, ci, k: (n, ci, 0)),
            ],
            out_specs=pl.BlockSpec((pl.Squeezed(), c_tile, hw_chunk_c),
                                   lambda n, ci, k: (n, ci, k)),
        ),
        compiler_params=pltpu.CompilerParams(
            dimension_semantics=("parallel", "parallel", "parallel"),
            vmem_limit_bytes=_vmem_limit(footprint, cap),
        ),
    )(c3, scale, shift)


# ----------------------------------------------------------------------------
# Public wrapper.
# ----------------------------------------------------------------------------
@functools.partial(jax.jit, static_argnames=("_force_two_phase", "_max_hw_chunk"))
def adain(content, style, *, _force_two_phase=False, _max_hw_chunk=None):
    """AdaIN forward.  content, style: NCHW; spatial sizes may differ."""
    N, C, Hc, Wc = content.shape
    Ns, Cs, Hs, Ws = style.shape
    assert (N, C) == (Ns, Cs)

    hw_c = Hc * Wc
    hw_s = Hs * Ws
    c3 = content.reshape(N, C, hw_c)     # free reshape, stays NCHW-contiguous
    s3 = style.reshape(N, C, hw_s)

    bpe = max(content.dtype.itemsize, style.dtype.itemsize)
    cap = _vmem_capacity_bytes()
    budget = cap // 4                    # ~16 MiB on v7x, ~32 MiB on v5e/v6e

    c_tile = None if _force_two_phase else _fused_c_tile(N, C, hw_c, hw_s, bpe, budget)
    if c_tile is not None:
        out = _adain_fused(c3, s3, c_tile, cap)
    else:
        step = _channel_step(bpe)
        ct = step if C % step == 0 else C
        hw_chunk_c = _pick_hw_chunk(ct, hw_c, bpe, budget, _max_hw_chunk)
        hw_chunk_s = _pick_hw_chunk(ct, hw_s, bpe, budget, _max_hw_chunk)
        out = _adain_two_phase(c3, s3, ct, hw_chunk_c, hw_chunk_s, cap)
    return out.reshape(N, C, Hc, Wc)


def _adain_ref(content, style):
    """Pure-JAX reference mirroring the PyTorch module (unbiased variance)."""
    N, C = content.shape[:2]
    cf = content.reshape(N, C, -1)
    sf = style.reshape(N, C, -1)
    c_mean = cf.mean(axis=2)[:, :, None, None]
    c_std = jnp.sqrt(cf.var(axis=2, ddof=1) + EPS)[:, :, None, None]
    s_mean = sf.mean(axis=2)[:, :, None, None]
    s_std = jnp.sqrt(sf.var(axis=2, ddof=1) + EPS)[:, :, None, None]
    return (content - c_mean) / c_std * s_std + s_mean


if __name__ == "__main__":
    key = jax.random.PRNGKey(0)
    k_c, k_s, k_c2, k_s2 = jax.random.split(key, 4)

    # 1) Fast path: single fused kernel.
    N, C, H, W = 2, 4, 16, 16
    content = jax.random.normal(k_c, (N, C, H, W), jnp.float32)
    style = 2.0 * jax.random.normal(k_s, (N, C, H, W), jnp.float32) + 0.5
    out = jax.block_until_ready(adain(content, style))
    assert out.shape == (N, C, H, W), out.shape
    assert bool(jnp.all(jnp.isfinite(out)))
    err = float(jnp.max(jnp.abs(out - _adain_ref(content, style))))
    assert err < 1e-4, err

    # 2) Fallback path (streaming moments + chunked apply), forced at small
    #    shapes: different content/style spatial sizes and a non-dividing
    #    trailing chunk to exercise the lane masking.
    N2, C2 = 1, 8
    content2 = jax.random.normal(k_c2, (N2, C2, 20, 20), jnp.float32)
    style2 = 0.5 * jax.random.normal(k_s2, (N2, C2, 12, 12), jnp.float32) - 1.0
    out2 = jax.block_until_ready(
        adain(content2, style2, _force_two_phase=True, _max_hw_chunk=128))
    assert out2.shape == content2.shape
    err2 = float(jnp.max(jnp.abs(out2 - _adain_ref(content2, style2))))
    assert err2 < 1e-4, err2

    print("KERNEL_OK")
</pallas_src>

<mosaic_0001>
module attributes {stable_mosaic.version = 11 : i64} {
  func.func @_adain_fused_kernel(%arg0: i32, %arg1: i32, %arg2: memref<1x4x256xf32, #tpu.memory_space<vmem>>, %arg3: memref<1x4x256xf32, #tpu.memory_space<vmem>>, %arg4: memref<1x4x256xf32, #tpu.memory_space<vmem>>) attributes {dimension_semantics = [#tpu.dimension_semantics<parallel>, #tpu.dimension_semantics<parallel>], iteration_bounds = array<i64: 2, 1>, scalar_prefetch = 0 : i64, scratch_operands = 0 : i64, tpu.core_type = #tpu.core_type<tc>, window_params = [{transform_indices = @transform_0, window_bounds = array<i64: 1, 4, 256>}, {transform_indices = @transform_1, window_bounds = array<i64: 1, 4, 256>}, {transform_indices = @transform_2, window_bounds = array<i64: 1, 4, 256>}]} {
    %c0 = arith.constant 0 : index
    %c0_0 = arith.constant 0 : index
    %c0_1 = arith.constant 0 : index
    %0 = vector.load %arg2[%c0, %c0_0, %c0_1] : memref<1x4x256xf32, #tpu.memory_space<vmem>>, vector<1x4x256xf32>
    %1 = vector.shape_cast %0 : vector<1x4x256xf32> to vector<4x256xf32>
    %c0_2 = arith.constant 0 : index
    %c0_3 = arith.constant 0 : index
    %c0_4 = arith.constant 0 : index
    %2 = vector.load %arg3[%c0_2, %c0_3, %c0_4] : memref<1x4x256xf32, #tpu.memory_space<vmem>>, vector<1x4x256xf32>
    %3 = vector.shape_cast %2 : vector<1x4x256xf32> to vector<4x256xf32>
    %cst = arith.constant dense<0.000000e+00> : vector<4xf32>
    %4 = vector.multi_reduction <add>, %1, %cst [1] : vector<4x256xf32> to vector<4xf32>
    %5 = vector.shape_cast %4 : vector<4xf32> to vector<4x1xf32>
    %6 = arith.mulf %1, %1 : vector<4x256xf32>
    %cst_5 = arith.constant dense<0.000000e+00> : vector<4xf32>
    %7 = vector.multi_reduction <add>, %6, %cst_5 [1] : vector<4x256xf32> to vector<4xf32>
    %8 = vector.shape_cast %7 : vector<4xf32> to vector<4x1xf32>
    %cst_6 = arith.constant dense<0.000000e+00> : vector<4xf32>
    %9 = vector.multi_reduction <add>, %3, %cst_6 [1] : vector<4x256xf32> to vector<4xf32>
    %10 = vector.shape_cast %9 : vector<4xf32> to vector<4x1xf32>
    %11 = arith.mulf %3, %3 : vector<4x256xf32>
    %cst_7 = arith.constant dense<0.000000e+00> : vector<4xf32>
    %12 = vector.multi_reduction <add>, %11, %cst_7 [1] : vector<4x256xf32> to vector<4xf32>
    %13 = vector.shape_cast %12 : vector<4xf32> to vector<4x1xf32>
    %cst_8 = arith.constant 2.560000e+02 : f32
    %14 = vector.broadcast %cst_8 : f32 to vector<4x1xf32>
    %15 = arith.divf %5, %14 : vector<4x1xf32>
    %cst_9 = arith.constant 2.560000e+02 : f32
    %16 = vector.broadcast %cst_9 : f32 to vector<4x1xf32>
    %17 = arith.divf %10, %16 : vector<4x1xf32>
    %cst_10 = arith.constant 2.560000e+02 : f32
    %18 = vector.broadcast %cst_10 : f32 to vector<4x1xf32>
    %19 = arith.mulf %18, %15 : vector<4x1xf32>
    %20 = arith.mulf %19, %15 : vector<4x1xf32>
    %21 = arith.subf %8, %20 : vector<4x1xf32>
    %cst_11 = arith.constant 2.550000e+02 : f32
    %22 = vector.broadcast %cst_11 : f32 to vector<4x1xf32>
    %23 = arith.divf %21, %22 : vector<4x1xf32>
    %cst_12 = arith.constant 2.560000e+02 : f32
    %24 = vector.broadcast %cst_12 : f32 to vector<4x1xf32>
    %25 = arith.mulf %24, %17 : vector<4x1xf32>
    %26 = arith.mulf %25, %17 : vector<4x1xf32>
    %27 = arith.subf %13, %26 : vector<4x1xf32>
    %cst_13 = arith.constant 2.550000e+02 : f32
    %28 = vector.broadcast %cst_13 : f32 to vector<4x1xf32>
    %29 = arith.divf %27, %28 : vector<4x1xf32>
    %cst_14 = arith.constant 9.99999974E-6 : f32
    %30 = vector.broadcast %cst_14 : f32 to vector<4x1xf32>
    %31 = arith.addf %29, %30 : vector<4x1xf32>
    %32 = math.sqrt %31 : vector<4x1xf32>
    %cst_15 = arith.constant 9.99999974E-6 : f32
    %33 = vector.broadcast %cst_15 : f32 to vector<4x1xf32>
    %34 = arith.addf %23, %33 : vector<4x1xf32>
    %35 = math.rsqrt %34 : vector<4x1xf32>
    %36 = arith.mulf %32, %35 : vector<4x1xf32>
    %37 = arith.mulf %15, %36 : vector<4x1xf32>
    %38 = arith.subf %17, %37 : vector<4x1xf32>
    %39 = vector.broadcast %36 : vector<4x1xf32> to vector<4x256xf32>
    %40 = arith.mulf %1, %39 : vector<4x256xf32>
    %41 = vector.broadcast %38 : vector<4x1xf32> to vector<4x256xf32>
    %42 = arith.addf %40, %41 : vector<4x256xf32>
    %c0_16 = arith.constant 0 : index
    %c0_17 = arith.constant 0 : index
    %c0_18 = arith.constant 0 : index
    %43 = vector.load %arg4[%c0_16, %c0_17, %c0_18] : memref<1x4x256xf32, #tpu.memory_space<vmem>>, vector<1x4x256xf32>
    %44 = vector.shape_cast %43 : vector<1x4x256xf32> to vector<4x256xf32>
    %45 = vector.shape_cast %42 : vector<4x256xf32> to vector<1x4x256xf32>
    tpu.vector_store %arg4[%c0_16, %c0_17, %c0_18], %45 {strides = array<i32>} : memref<1x4x256xf32, #tpu.memory_space<vmem>>, vector<1x4x256xf32>,
    return
  }
  func.func @transform_0(%arg0: i32, %arg1: i32) -> (i32, i32, i32) {
    %c0_i32 = arith.constant 0 : i32
    %c0_i32_0 = arith.constant 0 : i32
    return %arg0, %arg1, %c0_i32 : i32, i32, i32
  }
  func.func @transform_1(%arg0: i32, %arg1: i32) -> (i32, i32, i32) {
    %c0_i32 = arith.constant 0 : i32
    %c0_i32_0 = arith.constant 0 : i32
    return %arg0, %arg1, %c0_i32 : i32, i32, i32
  }
  func.func @transform_2(%arg0: i32, %arg1: i32) -> (i32, i32, i32) {
    %c0_i32 = arith.constant 0 : i32
    %c0_i32_0 = arith.constant 0 : i32
    return %arg0, %arg1, %c0_i32 : i32, i32, i32
  }
}

</mosaic_0001>

<bundles_post_ra>
// kernel: adain.1
= control target key start
LH: loop header
LB: loop body
LE: loop exit
PB: predicated region body
PF: predicated region fallthrough
CT: control target
= control target key end

     0   :  { %s497_s9 = smov 0   ;;  %s499_s10 = smov 0   ;;  %s546_s0 = inlined_call_operand.vmem [shape: f32[2,4,256], index: 0, kind: input, shape index: {}]   ;;  %s547_s1 = inlined_call_operand.vmem [shape: f32[2,4,256], index: 1, kind: input, shape index: {}]   ;;  %s548_s2 = inlined_call_operand.vmem [shape: f32[2,4,256], index: 2, kind: output, shape index: {}]  }
   0x1   :  { %s501_s11 = smov 0  }
   0x2 LB: > { %s24_s12 = sadd.s32 1, %s475_s10  ;;  %p414_p0 = scmp.ge.s32.totalorder %s479_s11, 1  ;;  %s479_s11 = sphi %s501_s11, %s12_s11   ;;  %s475_s10 = sphi %s499_s10, %s550_s10   ;;  %s471_s9 = sphi %s497_s9, %s549_s9  }
   0x3   : > { %p26_p1 = scmp.ge.s32.totalorder %s24_s12, 2  ;;  %p148_p2 = scmp.lt.s32.totalorder %s479_s11, 3 }
   0x5   : > { %s552_s12 = smov (%p26_p1, %s24_s12), 0  ;;  %p149_p3 = pnand %p414_p0, %p148_p2 }
   0x6   : > { %p187_p4 = scmp.lt.s32.totalorder (!%p149_p3), %s471_s9, 1 }
   0x7   : > { %152 = sbr.rel (%p149_p3) target bundleno = 200 (0xc8), region = 28 }
   0xc   : > { %s554_s9 = smov (!%p187_p4, %s471_s9), 1  ;;  %vm219_vm0 = vcmask 1043456   ;;  %v481_v36 = vmov 839922192   ;;  %v280_v38 = vlaneseq }
   0xd   : > { %s515_s13 = sshll.u32 %s554_s9, 3  ;;  %v278_v37 = vunpack.c.l.s4 %v481_v36 }
   0xe   : > { %s204_s16 = scalar_lea.vmem %s547_s1, %s515_s13  ;;  %s195_s19 = scalar_lea.vmem %s546_s0, %s515_s13  ;;  %v281_v41 = vshrl.u32 %v280_v38, 7 }
   0xf   : > { %v215_v0 = vld [vmem:[%s204_s16] sm:$0xff]  ;;  %v279_v40 = vunpack.c.0.s8 %v278_v37  ;;  %s213_s22 = scalar_lea.vmem %s548_s2, %s515_s13 }
  0x10   : > { %v235_v1 = vcombine.high %v215_v0, %v215_v0  ;;  %v237_v2 = vsel %vm219_vm0, %v215_v0, 0.0  ;;  %v214_v3 = vld [vmem:[%s195_s19] sm:$0xff]  ;;  %v242_v4 = vmul.f32 %v215_v0, %v215_v0 }
  0x11   : > { %v217_v5 = vcombine.high %v214_v3, %v214_v3  ;;  %v225_v6 = vmul.f32 %v214_v3, %v214_v3  ;;  %v220_v8 = vsel %vm219_vm0, %v214_v3, 0.0  ;;  %v282_v46 = vsub.s32 %v279_v40, %v281_v41 }
  0x12   : > { %v238_v7 = vsel %vm219_vm0, %v235_v1, 0.0  ;;  %v244_v9 = vcombine.high %v242_v4, %v242_v4  ;;  %v246_v10 = vsel %vm219_vm0, %v242_v4, 0.0 }
  0x13   : > { %v239_v11 = vadd.f32 %v238_v7, %v237_v2  ;;  %v221_v12 = vsel %vm219_vm0, %v217_v5, 0.0  ;;  %v227_v13 = vcombine.high %v225_v6, %v225_v6  ;;  %v229_v15 = vsel %vm219_vm0, %v225_v6, 0.0 }
  0x14   : > { %v247_v14 = vsel %vm219_vm0, %v244_v9, 0.0  ;;  %v222_v16 = vadd.f32 %v221_v12, %v220_v8 }
  0x15   : > { %240 = vadd.xlane.f32.xlu0 %v239_v11  ;;  %v248_v17 = vadd.f32 %v247_v14, %v246_v10  ;;  %v230_v18 = vsel %vm219_vm0, %v227_v13, 0.0 }
  0x16   : > { %v231_v19 = vadd.f32 %v230_v18, %v229_v15 }
  0x17   : > { %249 = vadd.xlane.f32.xlu1 %v248_v17 }
  0x19   : > { %223 = vadd.xlane.f32.xlu0 %v222_v16 }
  0x1b   : > { %232 = vadd.xlane.f32.xlu1 %v231_v19 }
  0x9e   : > { %v241_v20 = vpop.xlane.xlu0 %240 }
  0x9f   : > { %v253_v21 = vmul.f32 0.00390625, %v241_v20 }
  0xa0   : > { %v250_v22 = vpop.xlane.xlu1 %249 }
  0xa1   : > { %v259_v23 = vmul.f32 256.0, %v253_v21 }
  0xa2   : > { %v224_v24 = vpop.xlane.xlu0 %223 }
  0xa3   : > { %v252_v25 = vmul.f32 0.00390625, %v224_v24  ;;  %v260_v26 = vmul.f32 %v259_v23, %v253_v21 }
  0xa4   : > { %v233_v29 = vpop.xlane.xlu1 %232 }
  0xa5   : > { %v254_v27 = vmul.f32 256.0, %v252_v25  ;;  %v261_v28 = vsub.f32 %v250_v22, %v260_v26 }
  0xa7   : > { %v262_v30 = vmul.f32 0.003921569, %v261_v28  ;;  %v255_v31 = vmul.f32 %v254_v27, %v252_v25 }
  0xa9   : > { %v263_v32 = vadd.f32 1e-05, %v262_v30  ;;  %v256_v33 = vsub.f32 %v233_v29, %v255_v31 }
  0xab   : > { %453 = vrsqrt.f32 %v263_v32  ;;  %v258_v34 = vmul.f32 0.003921569, %v256_v33  ;;  %vm266_vm1 = vcmp.eq.f32.partialorder %v263_v32, inf  ;;  %v269_v43 = vand.u32 2147483648, %v263_v32 }
  0xac   : > { %vm268_vm2 = vcmp.eq.f32.partialorder %v263_v32, 0.0 }
  0xad   : > { %v271_v35 = vadd.f32 1e-05, %v258_v34 }
  0xaf   : > { %455 = vrsqrt.f32 %v271_v35 }
  0xb8   : > { %v454_v39 = vpop.eup %453 }
  0xb9   : > { %v265_v42 = vmul.f32 %v454_v39, %v263_v32 }
  0xbb   : > { %v267_v44 = vsel %vm266_vm1, %v263_v32, %v265_v42 }
  0xbc   : > { %v270_v45 = vsel %vm268_vm2, %v269_v43, %v267_v44  ;;  %v456_v47 = vpop.eup %455 }
  0xbd   : > { %v273_v48 = vmul.f32 %v456_v47, %v270_v45 }
  0xbf   : > { %v274_v49 = vmul.f32 %v273_v48, %v252_v25  ;;  %v283_v50 = vrot.slane %v273_v48, %v282_v46 }
  0xc1   : > { %v275_v51 = vsub.f32 %v253_v21, %v274_v49  ;;  %v285_v52 = vmul.f32 %v283_v50, %v214_v3 }
  0xc3   : > { %v293_v53 = vrot.slane %v275_v51, %v282_v46 }
  0xc5   : > { %v295_v54 = vadd.f32 %v293_v53, %v285_v52 }
  0xc7   : > { %296 = vst [vmem:[%s213_s22] sm:$0xff] %v295_v54 }
  0xc8 PF: > { %s12_s11 = sadd.s32 1, %s479_s11   ;;  %s549_s9 = smov %s475_s10 }
  0xc9   : > { %p9_p5 = scmp.ge.s32.totalorder %s12_s11, 4   ;;  %s550_s10 = smov %s552_s12 }
  0xcb   :  { %11 = sbr.rel (!%p9_p5) target bundleno = 2 (0x2), region = 61 }

</bundles_post_ra>
